<compile_context>
chip_gen: v5e
topology: v5e:2x2
jax: 0.10.0
libtpu: 0.0.40
codegen_flags: <defaults>
</compile_context>

<pallas_src>
import functools

import jax
import jax.numpy as jnp
from jax.experimental import pallas as pl
from jax.experimental.pallas import tpu as pltpu


def _quantize_kernel(z_ref, emb_ref, esq_ref, zq_ref, counts_ref, sqerr_ref):
    z = z_ref[0]            # (e_dim, TT)  float32
    e = emb_ref[...]        # (K, e_dim)   float32
    e_sq = esq_ref[...]     # (K, 1)       float32   (precomputed ||e_k||^2)

    # cross[k, t] = sum_d e[k, d] * z[d, t]  ->  (K, TT); MXU, no transposes.
    cross = jax.lax.dot_general(
        e, z, dimension_numbers=(((1,), (0,)), ((), ())),
        preferred_element_type=jnp.float32)

    # Distance up to the per-token constant ||z_t||^2 (argmin-equivalent).
    d = e_sq - 2.0 * cross                                     # (K, TT)

    k_codes = d.shape[0]
    row = jax.lax.broadcasted_iota(jnp.int32, d.shape, 0)      # code index per row
    min_d = jnp.min(d, axis=0, keepdims=True)                  # (1, TT)
    # First index on ties, matching torch.argmin.
    idx = jnp.min(jnp.where(d == min_d, row, k_codes), axis=0, keepdims=True)
    one_hot = (row == idx).astype(jnp.float32)                 # (K, TT)

    # Codebook lookup as a one-hot matmul on the MXU: (e_dim, TT).
    z_q = jax.lax.dot_general(
        e, one_hot, dimension_numbers=(((0,), (0,)), ((), ())),
        preferred_element_type=jnp.float32)
    zq_ref[0] = z_q

    # Per-tile partial code-usage counts -> (K, 1).
    counts_ref[0, 0] = jnp.sum(one_hot, axis=1, keepdims=True)

    # Per-tile partial sum of squared error between z_q and z -> (1, 1).
    diff = z_q - z
    sqerr_ref[0, 0] = jnp.sum(diff * diff, keepdims=True)


def _pick_tile(T, target):
    """Largest multiple of 128 <= target that divides T; falls back to T."""
    if T % 128 != 0 or T <= 128:
        return T
    tt = min(target, T)
    tt -= tt % 128
    tt = max(tt, 128)
    while T % tt != 0:
        tt -= 128
    return tt


@functools.partial(jax.jit, static_argnames=("beta", "tile_t"))
def quantizer_forward(z, embedding, beta, tile_t=512):
    """z: (N, e_dim, T) float32; embedding: (n_e, e_dim) float32."""
    N, e_dim, T = z.shape
    n_e = embedding.shape[0]
    M = N * T

    TT = _pick_tile(T, tile_t)
    num_tt = T // TT

    # Grid-invariant codebook norms, computed once (not per grid step).
    e_sq = jnp.sum(embedding * embedding, axis=1, keepdims=True)  # (n_e, 1)

    z_q, counts, sqerr = pl.pallas_call(
        _quantize_kernel,
        grid=(N, num_tt),
        in_specs=[
            # z tile straight from the (N, e_dim, T) layout (no transpose glue).
            pl.BlockSpec((1, e_dim, TT), lambda n, t: (n, 0, t)),
            # codebook + its norms stay resident across the whole grid.
            pl.BlockSpec((n_e, e_dim), lambda n, t: (0, 0)),
            pl.BlockSpec((n_e, 1), lambda n, t: (0, 0)),
        ],
        out_specs=[
            pl.BlockSpec((1, e_dim, TT), lambda n, t: (n, 0, t)),
            pl.BlockSpec((1, 1, n_e, 1), lambda n, t: (n, t, 0, 0)),
            pl.BlockSpec((1, 1, 1, 1), lambda n, t: (n, t, 0, 0)),
        ],
        out_shape=[
            jax.ShapeDtypeStruct((N, e_dim, T), jnp.float32),
            jax.ShapeDtypeStruct((N, num_tt, n_e, 1), jnp.float32),
            jax.ShapeDtypeStruct((N, num_tt, 1, 1), jnp.float32),
        ],
        compiler_params=pltpu.CompilerParams(
            dimension_semantics=("parallel", "parallel"),
            vmem_limit_bytes=32 * 1024 * 1024,
        ),
    )(z, embedding, e_sq)

    # loss = mean((z_q - z.detach())^2) + beta * mean((z_q.detach() - z)^2)
    # Forward value of both terms is identical -> (1 + beta) * MSE.
    mse = jnp.sum(sqerr) / (M * e_dim)
    loss = (1.0 + beta) * mse

    # Perplexity from mean one-hot usage.
    e_mean = jnp.sum(counts, axis=(0, 1, 3)) / M                 # (n_e,)
    perplexity = jnp.exp(-jnp.sum(e_mean * jnp.log(e_mean + 1e-10)))

    # Straight-through: forward value of z_q is just the quantized vectors,
    # already in the module's (N, e_dim, T) output layout.
    # TODO(synk): straight-through / detach gradient semantics are not
    # represented here (forward pass only).
    return z_q, loss, perplexity


if __name__ == "__main__":
    # Small, module-consistent shapes: n_e=64 codes, e_dim=32, batch N=2, T=256.
    n_e, e_dim, beta = 64, 32, 0.25
    N, T = 2, 256

    key = jax.random.PRNGKey(0)
    k_emb, k_z = jax.random.split(key)

    # embedding.weight.data.uniform_(-1/n_e, 1/n_e)
    embedding = jax.random.uniform(
        k_emb, (n_e, e_dim), dtype=jnp.float32, minval=-1.0 / n_e, maxval=1.0 / n_e
    )
    z = jax.random.normal(k_z, (N, e_dim, T), dtype=jnp.float32)

    # tile_t=128 -> grid (N, 2): exercises the tiled / pipelined path.
    z_q, loss, perplexity = quantizer_forward(z, embedding, beta, tile_t=128)
    jax.block_until_ready((z_q, loss, perplexity))

    # Reference check in plain JAX (same math as the PyTorch module).
    z_flat = jnp.transpose(z, (0, 2, 1)).reshape(-1, e_dim)
    d_ref = (
        jnp.sum(z_flat**2, axis=1, keepdims=True)
        + jnp.sum(embedding**2, axis=1)
        - 2.0 * z_flat @ embedding.T
    )
    idx_ref = jnp.argmin(d_ref, axis=1)
    zq_ref = embedding[idx_ref]
    loss_ref = (1.0 + beta) * jnp.mean((zq_ref - z_flat) ** 2)
    oh = jax.nn.one_hot(idx_ref, n_e, dtype=jnp.float32)
    em = jnp.mean(oh, axis=0)
    ppl_ref = jnp.exp(-jnp.sum(em * jnp.log(em + 1e-10)))
    zq_ref_out = jnp.transpose(zq_ref.reshape(N, T, e_dim), (0, 2, 1))

    assert jnp.allclose(z_q, zq_ref_out, atol=1e-5, rtol=1e-5)
    assert jnp.allclose(loss, loss_ref, atol=1e-5, rtol=1e-4)
    assert jnp.allclose(perplexity, ppl_ref, atol=1e-4, rtol=1e-4)

    print("KERNEL_OK")
</pallas_src>

<mosaic_0001>
module attributes {stable_mosaic.version = 11 : i64} {
  func.func @_quantize_kernel(%arg0: i32, %arg1: i32, %arg2: memref<1x32x128xf32, #tpu.memory_space<vmem>>, %arg3: memref<64x32xf32, #tpu.memory_space<vmem>>, %arg4: memref<64x1xf32, #tpu.memory_space<vmem>>, %arg5: memref<1x32x128xf32, #tpu.memory_space<vmem>>, %arg6: memref<1x1x64x1xf32, #tpu.memory_space<vmem>>, %arg7: memref<1x1x1x1xf32, #tpu.memory_space<vmem>>) attributes {dimension_semantics = [#tpu.dimension_semantics<parallel>, #tpu.dimension_semantics<parallel>], iteration_bounds = array<i64: 2, 2>, scalar_prefetch = 0 : i64, scratch_operands = 0 : i64, tpu.core_type = #tpu.core_type<tc>, window_params = [{transform_indices = @transform_0, window_bounds = array<i64: 1, 32, 128>}, {pipeline_mode = #tpu.pipeline_mode<synchronous>, transform_indices = @transform_1, window_bounds = array<i64: 64, 32>}, {pipeline_mode = #tpu.pipeline_mode<synchronous>, transform_indices = @transform_2, window_bounds = array<i64: 64, 1>}, {transform_indices = @transform_3, window_bounds = array<i64: 1, 32, 128>}, {transform_indices = @transform_4, window_bounds = array<i64: 1, 1, 64, 1>}, {transform_indices = @transform_5, window_bounds = array<i64: 1, 1, 1, 1>}]} {
    %c0 = arith.constant 0 : index
    %c0_0 = arith.constant 0 : index
    %c0_1 = arith.constant 0 : index
    %0 = vector.load %arg2[%c0, %c0_0, %c0_1] : memref<1x32x128xf32, #tpu.memory_space<vmem>>, vector<1x32x128xf32>
    %1 = vector.shape_cast %0 : vector<1x32x128xf32> to vector<32x128xf32>
    %c0_2 = arith.constant 0 : index
    %c0_3 = arith.constant 0 : index
    %2 = vector.load %arg3[%c0_2, %c0_3] : memref<64x32xf32, #tpu.memory_space<vmem>>, vector<64x32xf32>
    %c0_4 = arith.constant 0 : index
    %c0_5 = arith.constant 0 : index
    %3 = vector.load %arg4[%c0_4, %c0_5] : memref<64x1xf32, #tpu.memory_space<vmem>>, vector<64x1xf32>
    %cst = arith.constant dense<0.000000e+00> : vector<64x128xf32>
    %4 = tpu.matmul %2, %1, %cst {dimension_numbers = #tpu.dot_dimension_numbers<[1], [0], [0], [1], [0, 0, 1, 1], [], []>} : vector<64x32xf32>, vector<32x128xf32>, vector<64x128xf32> -> vector<64x128xf32>
    %cst_6 = arith.constant 2.000000e+00 : f32
    %5 = vector.broadcast %cst_6 : f32 to vector<64x128xf32>
    %6 = arith.mulf %5, %4 : vector<64x128xf32>
    %7 = vector.broadcast %3 : vector<64x1xf32> to vector<64x128xf32>
    %8 = arith.subf %7, %6 : vector<64x128xf32>
    %9 = tpu.iota {dimensions = array<i32: 0>} : vector<64x128xi32>
    %cst_7 = arith.constant dense<0x7F800000> : vector<128xf32>
    %10 = vector.multi_reduction <minimumf>, %8, %cst_7 [0] : vector<64x128xf32> to vector<128xf32>
    %11 = vector.shape_cast %10 : vector<128xf32> to vector<1x128xf32>
    %12 = vector.broadcast %11 : vector<1x128xf32> to vector<64x128xf32>
    %13 = arith.cmpf oeq, %8, %12 : vector<64x128xf32>
    %c64_i32 = arith.constant 64 : i32
    %14 = vector.broadcast %c64_i32 : i32 to vector<64x128xi32>
    %15 = arith.select %13, %9, %14 : vector<64x128xi1>, vector<64x128xi32>
    %cst_8 = arith.constant dense<2147483647> : vector<128xi32>
    %16 = vector.multi_reduction <minsi>, %15, %cst_8 [0] : vector<64x128xi32> to vector<128xi32>
    %17 = vector.shape_cast %16 : vector<128xi32> to vector<1x128xi32>
    %18 = vector.broadcast %17 : vector<1x128xi32> to vector<64x128xi32>
    %19 = arith.cmpi eq, %9, %18 : vector<64x128xi32>
    %20 = arith.extui %19 : vector<64x128xi1> to vector<64x128xi32>
    %21 = arith.sitofp %20 : vector<64x128xi32> to vector<64x128xf32>
    %cst_9 = arith.constant dense<0.000000e+00> : vector<32x128xf32>
    %22 = tpu.matmul %2, %21, %cst_9 {dimension_numbers = #tpu.dot_dimension_numbers<[0], [0], [1], [1], [0, 1, 1, 1], [], []>} : vector<64x32xf32>, vector<64x128xf32>, vector<32x128xf32> -> vector<32x128xf32>
    %c0_10 = arith.constant 0 : index
    %c0_11 = arith.constant 0 : index
    %c0_12 = arith.constant 0 : index
    %23 = vector.load %arg5[%c0_10, %c0_11, %c0_12] : memref<1x32x128xf32, #tpu.memory_space<vmem>>, vector<1x32x128xf32>
    %24 = vector.shape_cast %23 : vector<1x32x128xf32> to vector<32x128xf32>
    %25 = vector.shape_cast %22 : vector<32x128xf32> to vector<1x32x128xf32>
    tpu.vector_store %arg5[%c0_10, %c0_11, %c0_12], %25 {strides = array<i32>} : memref<1x32x128xf32, #tpu.memory_space<vmem>>, vector<1x32x128xf32>,
    %cst_13 = arith.constant dense<0.000000e+00> : vector<64xf32>
    %26 = vector.multi_reduction <add>, %21, %cst_13 [1] : vector<64x128xf32> to vector<64xf32>
    %27 = vector.shape_cast %26 : vector<64xf32> to vector<64x1xf32>
    %c0_14 = arith.constant 0 : index
    %c0_15 = arith.constant 0 : index
    %c0_16 = arith.constant 0 : index
    %c0_17 = arith.constant 0 : index
    %28 = vector.load %arg6[%c0_14, %c0_15, %c0_16, %c0_17] : memref<1x1x64x1xf32, #tpu.memory_space<vmem>>, vector<1x1x64x1xf32>
    %29 = vector.shape_cast %28 : vector<1x1x64x1xf32> to vector<64x1xf32>
    %30 = vector.shape_cast %27 : vector<64x1xf32> to vector<1x1x64x1xf32>
    tpu.vector_store %arg6[%c0_14, %c0_15, %c0_16, %c0_17], %30 {strides = array<i32>} : memref<1x1x64x1xf32, #tpu.memory_space<vmem>>, vector<1x1x64x1xf32>,
    %31 = arith.subf %22, %1 : vector<32x128xf32>
    %32 = arith.mulf %31, %31 : vector<32x128xf32>
    %33 = vector.shape_cast %32 : vector<32x128xf32> to vector<1x32x128xf32>
    %cst_18 = arith.constant dense<0.000000e+00> : vector<1xf32>
    %34 = vector.multi_reduction <add>, %33, %cst_18 [1, 2] : vector<1x32x128xf32> to vector<1xf32>
    %35 = vector.shape_cast %34 : vector<1xf32> to vector<1x1x1xf32>
    %36 = vector.extract %35[0, 0, 0] : f32 from vector<1x1x1xf32>
    %37 = vector.broadcast %36 : f32 to vector<1x1xf32>
    %c0_19 = arith.constant 0 : index
    %c0_20 = arith.constant 0 : index
    %c0_21 = arith.constant 0 : index
    %c0_22 = arith.constant 0 : index
    %38 = vector.load %arg7[%c0_19, %c0_20, %c0_21, %c0_22] : memref<1x1x1x1xf32, #tpu.memory_space<vmem>>, vector<1x1x1x1xf32>
    %39 = vector.shape_cast %38 : vector<1x1x1x1xf32> to vector<1x1xf32>
    %40 = vector.shape_cast %37 : vector<1x1xf32> to vector<1x1x1x1xf32>
    tpu.vector_store %arg7[%c0_19, %c0_20, %c0_21, %c0_22], %40 {strides = array<i32>} : memref<1x1x1x1xf32, #tpu.memory_space<vmem>>, vector<1x1x1x1xf32>,
    return
  }
  func.func @transform_0(%arg0: i32, %arg1: i32) -> (i32, i32, i32) {
    %c0_i32 = arith.constant 0 : i32
    %c0_i32_0 = arith.constant 0 : i32
    return %arg0, %c0_i32, %arg1 : i32, i32, i32
  }
  func.func @transform_1(%arg0: i32, %arg1: i32) -> (i32, i32) {
    %c0_i32 = arith.constant 0 : i32
    %c0_i32_0 = arith.constant 0 : i32
    %c0_i32_1 = arith.constant 0 : i32
    return %c0_i32, %c0_i32_0 : i32, i32
  }
  func.func @transform_2(%arg0: i32, %arg1: i32) -> (i32, i32) {
    %c0_i32 = arith.constant 0 : i32
    %c0_i32_0 = arith.constant 0 : i32
    %c0_i32_1 = arith.constant 0 : i32
    return %c0_i32, %c0_i32_0 : i32, i32
  }
  func.func @transform_3(%arg0: i32, %arg1: i32) -> (i32, i32, i32) {
    %c0_i32 = arith.constant 0 : i32
    %c0_i32_0 = arith.constant 0 : i32
    return %arg0, %c0_i32, %arg1 : i32, i32, i32
  }
  func.func @transform_4(%arg0: i32, %arg1: i32) -> (i32, i32, i32, i32) {
    %c0_i32 = arith.constant 0 : i32
    %c0_i32_0 = arith.constant 0 : i32
    %c0_i32_1 = arith.constant 0 : i32
    return %arg0, %arg1, %c0_i32, %c0_i32_0 : i32, i32, i32, i32
  }
  func.func @transform_5(%arg0: i32, %arg1: i32) -> (i32, i32, i32, i32) {
    %c0_i32 = arith.constant 0 : i32
    %c0_i32_0 = arith.constant 0 : i32
    %c0_i32_1 = arith.constant 0 : i32
    return %arg0, %arg1, %c0_i32, %c0_i32_0 : i32, i32, i32, i32
  }
}

</mosaic_0001>

<bundles_post_ra>
// kernel: quantizer_forward.1
= control target key start
LH: loop header
LB: loop body
LE: loop exit
PB: predicated region body
PF: predicated region fallthrough
CT: control target
= control target key end

     0   :  { %s1484_s0 = inlined_call_operand.vmem [shape: f32[2,32,256], index: 0, kind: input, shape index: {}]   ;;  %s1485_s1 = inlined_call_operand.vmem [shape: f32[64,32], index: 1, kind: input, shape index: {}]   ;;  %s1486_s2 = inlined_call_operand.vmem [shape: f32[64,1], index: 2, kind: input, shape index: {}]   ;;  %s1487_s3 = inlined_call_operand.hbm [shape: f32[2,32,256], index: 3, kind: output, shape index: {0}]   ;;  %s1488_s4 = inlined_call_operand.vmem [shape: f32[2,2,64,1], index: 4, kind: output, shape index: {1}]   ;;  %s1489_s5 = inlined_call_operand.vmem [shape: f32[2,2,1,1], index: 5, kind: output, shape index: {2}]  }
   0x1   :  { %1491 = sst [smem:[#allocation6_spill]] %s1484_s0 }
   0x2   :  { %1492 = sst [smem:[#allocation7_spill]] %s1485_s1 }
   0x3   :  { %1493 = sst [smem:[#allocation8_spill]] %s1486_s2 }
   0x4   :  { %1494 = sst [smem:[#allocation9_spill]] %s1488_s4 }
   0x5   :  { %11 = vsyncpa [#allocation4], 0 }
   0x6   :  { %13 = vsyncpa [#allocation4 + $0x1], 0  ;;  %s1149_s18 = smov 0   ;;  %s1151_s19 = smov 0  }
   0x7   :  { %s1153_s20 = smov 0   ;;  %s1155_s21 = smov 0  }
   0x8   :  { %s1157_s22 = smov 0   ;;  %s1159_s23 = smov 0  }
   0x9   :  { %s1161_s24 = smov 0   ;;  %s1163_s25 = smov 0  }
   0xa LB: > { %s876_s26 = sadd.s32 4294967295, %s1111_s25   ;;  %s877_s27 = sadd.s32 4294967294, %s1111_s25   ;;  %s1111_s25 = sphi %s1163_s25, %s19_s25   ;;  %s1107_s24 = sphi %s1161_s24, %s1509_s24   ;;  %s1103_s23 = sphi %s1159_s23, %s1508_s23   ;;  %s1099_s22 = sphi %s1157_s22, %s1507_s22   ;;  %s1095_s21 = sphi %s1155_s21, %s1506_s21   ;;  %s1091_s20 = sphi %s1153_s20, %s1505_s20   ;;  %s1087_s19 = sphi %s1151_s19, %s1504_s19   ;;  %s1083_s18 = sphi %s1149_s18, %s1503_s18  }
   0xb   : > { %s28_s28 = sadd.s32 1, %s1103_s23  ;;  %s31_s29 = sadd.s32 1, %s1107_s24 }
   0xc   : > { %p29_p0 = scmp.ge.s32.totalorder %s28_s28, 2  ;;  %p47_p1 = scmp.ne.s32.totalorder %s1091_s20, %s1087_s19 }
   0xd   : > { %p48_p2 = scmp.eq.s32.totalorder %s1111_s25, 0  ;;  %p121_p5 = scmp.eq.s32.totalorder %s876_s26, 3 }
   0xe   : > { %s1511_s28 = smov (%p29_p0, %s28_s28), 0  ;;  %s1513_s29 = smov (!%p29_p0, %s31_s29), %s1107_s24 }
   0xf   : > { %s36_s30 = ssub.s32 %s1103_s23, %s1511_s28  ;;  %p1201_p3 = por %p48_p2, %p47_p1 }
  0x10   : > { %p33_p4 = scmp.ge.s32.totalorder %s1513_s29, 2  ;;  %p126_p6 = scmp.ne.s32.totalorder %s1087_s19, %s1083_s18 }
  0x11   : > { %p127_p7 = scmp.eq.s32.totalorder %s877_s27, 3  ;;  %p1209_p8 = por %p121_p5, %p47_p1 }
  0x12   : > { %s1515_s29 = smov (%p33_p4, %s1513_s29), 0  ;;  %s40_s11 = sadd.s32 1, %s1091_s20 }
  0x13   : > { %p1213_p9 = por %p127_p7, %p126_p6  ;;  %s35_s9 = ssub.s32 %s1107_s24, %s1515_s29 }
  0x14   : > { %s37_s10 = sor.u32 %s36_s30, %s35_s9  ;;  %p879_p11 = scmp.ge.s32.totalorder %s1111_s25, 4 }
  0x15   : > { %p38_p10 = scmp.eq.s32.totalorder %s37_s10, 0 }
  0x16   : > { %205 = sbr.rel (%p879_p11) target bundleno = 41 (0x29), region = 24 }
  0x17   : > { %s1221_s12 = scalar_select %p38_p10, %s1091_s20, %s40_s11  }
  0x1b   : > { %208 = sbr.rel (!%p1201_p3) target bundleno = 41 (0x29), region = 28  ;;  %s210_s13 = sand.u32 (%p1201_p3), 1, %s1091_s20  }
  0x1c   : > { %s881_s14 = sshll.u32 (%p1201_p3), %s1107_s24, 3  ;;  %s880_s15 = sshll.u32 (%p1201_p3), %s210_s13, 5 }
  0x1d   : > { %s214_s16 = sadd.s32 (%p1201_p3), %s1103_s23, %s881_s14  ;;  %s1498_s0 = sld [smem:[#allocation6_spill]] (%p1201_p3) }
  0x1e   : > { %s882_s17 = sshll.u32 (%p1201_p3), %s214_s16, 3  ;;  %s212_s9 = scalar_lea.vmem (%p1201_p3), [#allocation2], %s880_s15 }
  0x23   : > { %s216_s30 = scalar_lea.vmem %s1498_s0, %s882_s17 }
  0x24   : > { %v251_v0 = vld [vmem:[%s216_s30] sm:$0xff]  ;;  %v253_v1 = vld [vmem:[%s216_s30 + $0x10] sm:$0xff] }
  0x25   : > { %v255_v2 = vld [vmem:[%s216_s30 + $0x20] sm:$0xff]  ;;  %252 = vst [vmem:[%s212_s9] sm:$0xff] %v251_v0  ;;  %v257_v3 = vld [vmem:[%s216_s30 + $0x30] sm:$0xff] }
  0x26   : > { %254 = vst [vmem:[%s212_s9 + $0x8] sm:$0xff] %v253_v1 }
  0x27   : > { %256 = vst [vmem:[%s212_s9 + $0x10] sm:$0xff] %v255_v2 }
  0x28   : > { %258 = vst [vmem:[%s212_s9 + $0x18] sm:$0xff] %v257_v3 }
  0x29 PF: > { %p883_p12 = scmp.ge.s32.totalorder %s1111_s25, 1  ;;  %p263_p13 = scmp.lt.s32.totalorder %s1111_s25, 5 }
  0x2b   : > { %p264_p0 = pnand %p883_p12, %p263_p13 }
  0x2c   : > { %s1490_s6 = sand.u32 (!%p264_p0), 1, %s1087_s19   ;;  %s1499_s2 = sld [smem:[#allocation8_spill]] (!%p264_p0) }
  0x2d   : > { %267 = sbr.rel (%p264_p0) target bundleno = 618 (0x26a), region = 66  ;;  %s1240_s13 = sshll.u32 (!%p264_p0), %s1490_s6, 5 }
  0x2e   : > { %s272_s16 = scalar_lea.vmem (!%p264_p0), [#allocation2], %s1240_s13  ;;  %s1500_s1 = sld [smem:[#allocation7_spill]] (!%p264_p0) }
  0x2f   : > { %p313_p1 = scmp.lt.s32.totalorder (!%p264_p0), %s1099_s22, 1  ;;  %p315_p2 = scmp.lt.s32.totalorder (!%p264_p0), %s1095_s21, 1 }
  0x30   : > { %s1501_s4 = sld [smem:[#allocation9_spill]] (!%p264_p0)  ;;  %s292_s14 = scalar_lea.vmem (!%p264_p0), [#allocation3], %s1240_s13 }
  0x31   : > { %s712_s13 = sshll.u32 (!%p264_p0), %s292_s14, 4  ;;  %s1502_s0 = sand.u32 (!%p264_p0), 1, %s1087_s19   ;;  %s713_s13 = int_to_ptr.vmem [resolvable:$true] %s712_s13 }
  0x32   : > { %v345_v4 = vld [vmem:[%s1499_s2 + $0x20] sm:$0xff]  ;;  %v1113_v5 = vmov 0   ;;  %v343_v6 = vld [vmem:[%s1499_s2 + $0x10] sm:$0xff]  ;;  %v1246_v7 = vld [vmem:[%s272_s16 + $0x18] sm:$0xff]  ;;  %vm349_vm0 = vcmask 261120   ;;  %v471_v2 = vlaneseq  ;;  %s1397_s15 = scalar_select %p313_p1, %s1099_s22, 1 }
  0x33   : > { %1016 = vset.pattern.permute.xlu2 %v1113_v5  ;;  %1015 = vset.pattern.permute.xlu1 %v1113_v5  ;;  %v1248_v8 = vld [vmem:[%s272_s16 + $0x10] sm:$0xff]  ;;  %v341_v9 = vld [vmem:[%s1499_s2] sm:$0xff]  ;;  %v1255_v10 = vld [vmem:[%s272_s16 + $0x8] sm:$0xff] }
  0x34   : > { %445 = vperm.xlu2 %1016, %v345_v4   ;;  %435 = vperm.xlu1 %1015, %v343_v6   ;;  %v1259_v11 = vld [vmem:[%s272_s16] sm:$0xff]  ;;  %v336_v12 = vld [vmem:[%s1500_s1 + $0x18] sm:$0xff]  ;;  %v346_v14 = vld [vmem:[%s1499_s2 + $0x28] sm:$0xff]  ;;  %s1400_s16 = scalar_select %p315_p2, %s1095_s21, 1 }
  0x35   : > { %1014 = vset.pattern.permute.xlu0 %v1113_v5  ;;  %923 = vmatpush.msra.mxu2 %v1246_v7  ;;  %v333_v13 = vld [vmem:[%s1500_s1] sm:$0xff]  ;;  %v344_v15 = vld [vmem:[%s1499_s2 + $0x18] sm:$0xff]  ;;  %v342_v16 = vld [vmem:[%s1499_s2 + $0x8] sm:$0xff]  ;;  %v1312_v5 = vshrl.u32 %v471_v2, 7  ;;  %s887_s26 = sshll.u32 %s1397_s15, 4 }
  0x36   : > { %386 = vmatpush.msra.mxu0 %v1246_v7  ;;  %425 = vperm.xlu0 %1014, %v341_v9   ;;  %v337_v17 = vld [vmem:[%s1500_s1 + $0x20] sm:$0xff]  ;;  %v334_v18 = vld [vmem:[%s1500_s1 + $0x8] sm:$0xff]  ;;  %v348_v19 = vld [vmem:[%s1499_s2 + $0x38] sm:$0xff]  ;;  %s886_s17 = sshll.u32 %s1400_s16, 3 }
  0x37   : > { %924 = vmatpush.msra.mxu2 %v1248_v8  ;;  %v347_v20 = vld [vmem:[%s1499_s2 + $0x30] sm:$0xff]  ;;  %v338_v21 = vld [vmem:[%s1500_s1 + $0x28] sm:$0xff]  ;;  %v340_v24 = vld [vmem:[%s1500_s1 + $0x38] sm:$0xff]  ;;  %s319_s27 = sadd.s32 %s887_s26, %s886_s17  ;;  %s919_s17 = sshll.u32 %s1099_s22, 3 }
  0x38   : > { %387 = vmatpush.msra.mxu0 %v1248_v8  ;;  %v335_v22 = vld [vmem:[%s1500_s1 + $0x10] sm:$0xff]  ;;  %s888_s30 = sshll.u32 %s319_s27, 3  ;;  %s709_s26 = sadd.s32 %s1095_s21, %s919_s17 }
  0x39   : > { %925 = vmatpush.msra.mxu2 %v1255_v10  ;;  %v339_v23 = vld [vmem:[%s1500_s1 + $0x30] sm:$0xff]  ;;  %s1407_s11 = scalar_lea.vmem %s1501_s4, %s888_s30  ;;  %s920_s27 = sshll.u32 %s709_s26, 3 }
  0x3a   : > { %388 = vmatpush.msra.mxu0 %v1255_v10  ;;  %s711_s10 = scalar_lea.hbm %s1487_s3, %s920_s27  ;;  %s683_s1 = scalar_lea.sflag [#allocation4], %s1502_s0 }
  0x3b   : > { %926 = vmatpush.msra.mxu2 %v1259_v11  ;;  %s714_s6 = sshll.u32 %s711_s10, 4  ;;  %s1037_s21 = scalar_lea.hbm %s1487_s3, 128  ;;  %s715_s6 = int_to_ptr.hbm [resolvable:$true] %s714_s6 }
  0x3c   : > { %389 = vmatpush.msra.mxu0 %v1259_v11  ;;  %893 = vmatmul.msk.f32.vlgmr.msra.gmra.mxu2 %vm349_vm0, %v336_v12  ;;  %s1031_s2 = sshra.s32 %s715_s6, 4  ;;  %s1032_s2 = int_to_ptr.hbm [resolvable:$true] %s1031_s2 }
  0x3d   : > { %890 = vmatmul.msk.f32.vlgmr.msra.gmra.mxu0 %vm349_vm0, %v333_v13  ;;  %450 = vperm.xlu2 %1016, %v346_v14   ;;  %v1321_v14 = vadd.s32 24, %v1312_v5  ;;  %s1033_s4 = scalar_lea.hbm %s1032_s2, 32  ;;  %p1038_p6 = scmp.lt.s32.totalorder %s1032_s2, %s1487_s3 }
  0x3e   : > { %440 = vperm.xlu1 %1015, %v344_v15   ;;  %430 = vperm.xlu0 %1014, %v342_v16   ;;  %v1324_v15 = vadd.s32 32, %v1312_v5  ;;  %v1327_v16 = vadd.s32 40, %v1312_v5  ;;  %p1034_p3 = scmp.ne.s32.totalorder %s1032_s2, %s1033_s4  ;;  %p1039_p7 = scmp.lt.s32.totalorder %s1037_s21, %s1033_s4 }
  0x40   : > { %p1035_p4 = pnand %p1034_p3, %p1209_p8  ;;  %p1040_p10 = por %p1039_p7, %p1038_p6 }
  0x42   : > { %p1036_p5 = pneg %p1035_p4 }
  0x44   : > { %894 = vmatmul.msk.f32.gmra.mxu2 %vm349_vm0, %v337_v17  ;;  %p1041_p11 = pnand %p1040_p10, %p1036_p5 }
  0x45   : > { %891 = vmatmul.msk.f32.gmra.mxu0 %vm349_vm0, %v334_v18 }
  0x46   : > { %460 = vperm.xlu1 %1015, %v348_v19   ;;  %455 = vperm.xlu0 %1014, %v347_v20  }
  0x4c   : > { %895 = vmatmul.msk.f32.gmra.mxu2 %vm349_vm0, %v338_v21 }
  0x4d   : > { %892 = vmatmul.msk.f32.gmra.mxu0 %vm349_vm0, %v335_v22 }
  0x54   : > { %896 = vmatmul.msk.f32.gmra.mxu2 %vm349_vm0, %v339_v23 }
  0x5c   : > { %897 = vmatmul.msk.f32.gmra.mxu2 %vm349_vm0, %v340_v24 }
  0x63   : > { %556 = vxpose.xlu2.b32.start [1/8] (short) (narrow) %v333_v13, 32  ;;  %v1318_v13 = vadd.s32 16, %v1312_v5 }
  0x6b   : > { %557 = vxpose.xlu2.b32.cont [2/8] (short) (narrow) %v334_v18, 32  ;;  %v479_v18 = vadd.s32 56, %v1312_v5 }
  0x73   : > { %558 = vxpose.xlu2.b32.cont [3/8] (short) (narrow) %v335_v22, 32 }
  0x7b   : > { %559 = vxpose.xlu2.b32.cont [4/8] (short) (narrow) %v336_v12, 32  ;;  %v1315_v12 = vadd.s32 8, %v1312_v5 }
  0x83   : > { %560 = vxpose.xlu2.b32.cont [5/8] (short) (narrow) %v337_v17, 32  ;;  %v1330_v17 = vadd.s32 48, %v1312_v5 }
  0x8b   : > { %561 = vxpose.xlu2.b32.cont [6/8] (short) (narrow) %v338_v21, 32 }
  0x8e   : > { %v446_v32 = vpop.permute.xlu2 %445 }
  0x93   : > { %562 = vxpose.xlu2.b32.cont [7/8] (short) (narrow) %v339_v23, 32 }
  0x97   : > { %v451_v42 = vpop.permute.xlu2 %450 }
  0x9b   : > { %563 = vxpose.xlu2.b32.end [8/8] (short) (narrow) %v340_v24, 32 }
  0xa6   : > { %v436_v29 = vpop.permute.xlu1 %435 }
  0xa8   : > { %v426_v28 = vpop.permute.xlu0 %425 }
  0xb0   : > { %v431_v33 = vpop.permute.xlu0 %430  ;;  %v441_v35 = vpop.permute.xlu1 %440 }
  0xb8   : > { %v456_v47 = vpop.permute.xlu0 %455  ;;  %v461_v53 = vpop.permute.xlu1 %460 }
  0xba   : > { %v391_v26 = vpop.f32.mrf.mxu0 }
  0xbb   : > { %v415_v39 = vmul.f32 2.0, %v391_v26 }
  0xbd   : > { %v463_v49 = vsub.f32 %v426_v28, %v415_v39 }
  0xbf   : > { %v400_v25 = vpop.f32.mrf.mxu2 }
  0xc0   : > { %v418_v43 = vmul.f32 2.0, %v400_v25 }
  0xc2   : > { %v394_v31 = vpop.f32.mrf.mxu0  ;;  %v466_v54 = vsub.f32 %v441_v35, %v418_v43 }
  0xc3   : > { %v416_v36 = vmul.f32 2.0, %v394_v31 }
  0xc5   : > { %v464_v44 = vsub.f32 %v431_v33, %v416_v36 }
  0xc7   : > { %v403_v27 = vpop.f32.mrf.mxu2 }
  0xc8   : > { %v419_v40 = vmul.f32 2.0, %v403_v27 }
  0xca   : > { %v397_v38 = vpop.f32.mrf.mxu0  ;;  %v467_v50 = vsub.f32 %v446_v32, %v419_v40 }
  0xcb   : > { %v417_v45 = vmul.f32 2.0, %v397_v38 }
  0xcc   : > { %v480_v58 = vmin.f32 %v463_v49, %v467_v50 }
  0xcd   : > { %v465_v55 = vsub.f32 %v436_v29, %v417_v45 }
  0xcf   : > { %v406_v30 = vpop.f32.mrf.mxu2 }
  0xd0   : > { %v420_v37 = vmul.f32 2.0, %v406_v30 }
  0xd2   : > { %v468_v46 = vsub.f32 %v451_v42, %v420_v37  ;;  %v1115_v42 = vmov 0.0  }
  0xd4   : > { %v481_v56 = vmin.f32 %v464_v44, %v468_v46 }
  0xd6   : > { %v484_v61 = vmin.f32 %v480_v58, %v481_v56 }
  0xd7   : > { %v409_v34 = vpop.f32.mrf.mxu2 }
  0xd8   : > { %v421_v41 = vmul.f32 2.0, %v409_v34 }
  0xda   : > { %v469_v51 = vsub.f32 %v456_v47, %v421_v41  ;;  %v1114_v41 = vmov 1.0  }
  0xdc   : > { %v482_v59 = vmin.f32 %v465_v55, %v469_v51 }
  0xdf   : > { %v412_v48 = vpop.f32.mrf.mxu2 }
  0xe0   : > { %v422_v52 = vmul.f32 2.0, %v412_v48 }
  0xe2   : > { %v470_v57 = vsub.f32 %v461_v53, %v422_v52 }
  0xe4   : > { %v483_v60 = vmin.f32 %v466_v54, %v470_v57 }
  0xe6   : > { %v485_v62 = vmin.f32 %v482_v59, %v483_v60 }
  0xe8   : > { %v486_v63 = vmin.f32 %v484_v61, %v485_v62 }
  0xea   : > { %v487_v0 = vrot.slane %v486_v63, 4 }
  0xec   : > { %v488_v1 = vmin.f32 %v486_v63, %v487_v0 }
  0xee   : > { %v489_v3 = vrot.slane %v488_v1, 2 }
  0xf0   : > { %v490_v4 = vmin.f32 %v488_v1, %v489_v3 }
  0xf2   : > { %v491_v6 = vrot.slane %v490_v4, 1 }
  0xf4   : > { %v492_v9 = vmin.f32 %v490_v4, %v491_v6 }
  0xf6   : > { %vm500_vm1 = vcmp.eq.f32.partialorder %v470_v57, %v492_v9  ;;  %vm493_vm2 = vcmp.eq.f32.partialorder %v463_v49, %v492_v9  ;;  %vm494_vm3 = vcmp.eq.f32.partialorder %v464_v44, %v492_v9  ;;  %vm495_vm4 = vcmp.eq.f32.partialorder %v465_v55, %v492_v9 }
  0xf7   : > { %vm496_vm5 = vcmp.eq.f32.partialorder %v466_v54, %v492_v9  ;;  %vm497_vm6 = vcmp.eq.f32.partialorder %v467_v50, %v492_v9  ;;  %vm498_vm7 = vcmp.eq.f32.partialorder %v468_v46, %v492_v9  ;;  %vm499_vm8 = vcmp.eq.f32.partialorder %v469_v51, %v492_v9 }
  0xf8   : > { %v501_v19 = vsel %vm493_vm2, %v1312_v5, 64  ;;  %v502_v20 = vsel %vm494_vm3, %v1315_v12, 64  ;;  %v503_v21 = vsel %vm495_vm4, %v1318_v13, 64  ;;  %v504_v22 = vsel %vm496_vm5, %v1321_v14, 64 }
  0xf9   : > { %v505_v23 = vsel %vm497_vm6, %v1324_v15, 64  ;;  %v506_v24 = vsel %vm498_vm7, %v1327_v16, 64  ;;  %v507_v25 = vsel %vm499_vm8, %v1330_v17, 64  ;;  %v508_v26 = vsel %vm500_vm1, %v479_v18, 64 }
  0xfa   : > { %vm509_vm9 = vcmp.lt.s32.totalorder %v501_v19, %v505_v23  ;;  %vm511_vm10 = vcmp.lt.s32.totalorder %v502_v20, %v506_v24  ;;  %vm513_vm11 = vcmp.lt.s32.totalorder %v503_v21, %v507_v25  ;;  %vm515_vm12 = vcmp.lt.s32.totalorder %v504_v22, %v508_v26 }
  0xfb   : > { %v510_v27 = vsel %vm509_vm9, %v501_v19, %v505_v23  ;;  %v512_v28 = vsel %vm511_vm10, %v502_v20, %v506_v24  ;;  %v514_v29 = vsel %vm513_vm11, %v503_v21, %v507_v25  ;;  %v516_v30 = vsel %vm515_vm12, %v504_v22, %v508_v26 }
  0xfc   : > { %vm517_vm13 = vcmp.lt.s32.totalorder %v510_v27, %v512_v28  ;;  %vm519_vm14 = vcmp.lt.s32.totalorder %v514_v29, %v516_v30  ;;  %v572_v40 = vpop.trf.xlu2  ;;  %vm588_vm11 = vcmask 523264   ;;  %vm650_vm12 = vcmask 7168  }
  0xfd   : > { %v518_v31 = vsel %vm517_vm13, %v510_v27, %v512_v28  ;;  %v520_v32 = vsel %vm519_vm14, %v514_v29, %v516_v30 }
  0xfe   : > { %vm521_vm15 = vcmp.lt.s32.totalorder %v518_v31, %v520_v32 }
  0xff   : > { %v522_v33 = vsel %vm521_vm15, %v518_v31, %v520_v32 }
 0x100   : > { %v523_v34 = vrot.slane %v522_v33, 4 }
 0x102   : > { %vm524_vm0 = vcmp.lt.s32.totalorder %v522_v33, %v523_v34 }
 0x103   : > { %v525_v35 = vsel %vm524_vm0, %v522_v33, %v523_v34 }
 0x104   : > { %v526_v36 = vrot.slane %v525_v35, 2  ;;  %v573_v49 = vpop.trf.xlu2 }
 0x106   : > { %vm527_vm2 = vcmp.lt.s32.totalorder %v525_v35, %v526_v36 }
 0x107   : > { %v528_v37 = vsel %vm527_vm2, %v525_v35, %v526_v36 }
 0x108   : > { %v529_v38 = vrot.slane %v528_v37, 1 }
 0x10a   : > { %vm530_vm1 = vcmp.lt.s32.totalorder %v528_v37, %v529_v38 }
 0x10b   : > { %v531_v39 = vsel %vm530_vm1, %v528_v37, %v529_v38 }
 0x10c   : > { %vm539_vm3 = vcmp.eq.s32.totalorder %v479_v18, %v531_v39  ;;  %vm532_vm4 = vcmp.eq.s32.totalorder %v1312_v5, %v531_v39  ;;  %vm537_vm5 = vcmp.eq.s32.totalorder %v1327_v16, %v531_v39  ;;  %vm535_vm6 = vcmp.eq.s32.totalorder %v1321_v14, %v531_v39  ;;  %v574_v51 = vpop.trf.xlu2 }
 0x10d   : > { %906 = vmatpush.msk.msra.mxu1 %vm539_vm3, %v1114_v41  ;;  %927 = vmatpush.msk.msra.mxu3 %vm539_vm3, %v1114_v41  ;;  %v898_v43 = vsel %vm532_vm4, 1.0, %v1115_v42  ;;  %vm538_vm7 = vcmp.eq.s32.totalorder %v1330_v17, %v531_v39  ;;  %vm533_vm8 = vcmp.eq.s32.totalorder %v1315_v12, %v531_v39  ;;  %v1359_v45 = vsel %vm535_vm6, 1.0, %v1115_v42 }
 0x10e   : > { %634 = vadd.xlane.f32.xlu1 %v898_v43  ;;  %v1355_v44 = vsel %vm533_vm8, 1.0, %v1115_v42  ;;  %v1363_v46 = vsel %vm537_vm5, 1.0, %v1115_v42  ;;  %v1366_v47 = vsel %vm539_vm3, 1.0, %v1115_v42  ;;  %vm536_vm9 = vcmp.eq.s32.totalorder %v1324_v15, %v531_v39 }
 0x10f   : > { %907 = vmatpush.msk.msra.mxu1 %vm538_vm7, %v1114_v41  ;;  %928 = vmatpush.msk.msra.mxu3 %vm538_vm7, %v1114_v41  ;;  %vm534_vm10 = vcmp.eq.s32.totalorder %v1318_v13, %v531_v39  ;;  %v902_v50 = vsel %vm536_vm9, 1.0, %v1115_v42  ;;  %v904_v52 = vsel %vm538_vm7, 1.0, %v1115_v42 }
 0x110   : > { %v900_v48 = vsel %vm534_vm10, 1.0, %v1115_v42 }
 0x111   : > { %908 = vmatpush.msk.msra.mxu1 %vm537_vm5, %v1114_v41  ;;  %929 = vmatpush.msk.msra.mxu3 %vm537_vm5, %v1114_v41 }
 0x113   : > { %909 = vmatpush.msk.msra.mxu1 %vm536_vm9, %v1114_v41  ;;  %930 = vmatpush.msk.msra.mxu3 %vm536_vm9, %v1114_v41 }
 0x114   : > { %v575_v53 = vpop.trf.xlu2 }
 0x115   : > { %910 = vmatpush.msk.msra.mxu1 %vm535_vm6, %v1114_v41  ;;  %931 = vmatpush.msk.msra.mxu3 %vm535_vm6, %v1114_v41 }
 0x116   : > { %638 = vadd.xlane.f32.xlu1 %v900_v48 }
 0x117   : > { %911 = vmatpush.msk.msra.mxu1 %vm534_vm10, %v1114_v41  ;;  %932 = vmatpush.msk.msra.mxu3 %vm534_vm10, %v1114_v41 }
 0x119   : > { %912 = vmatpush.msk.msra.mxu1 %vm533_vm8, %v1114_v41  ;;  %933 = vmatpush.msk.msra.mxu3 %vm533_vm8, %v1114_v41 }
 0x11b   : > { %913 = vmatpush.msk.msra.mxu1 %vm532_vm4, %v1114_v41  ;;  %934 = vmatpush.msk.msra.mxu3 %vm532_vm4, %v1114_v41 }
 0x11c   : > { %914 = vmatmul.msk.f32.vlgmr.msra.gmra.mxu1 %vm588_vm11, %v572_v40  ;;  %915 = vmatmul.msk.f32.vlgmr.msra.gmra.mxu3 %vm588_vm11, %v573_v49 }
 0x11e   : > { %642 = vadd.xlane.f32.xlu1 %v902_v50 }
 0x124   : > { %916 = vmatmul.msk.f32.gmra.mxu3 %vm588_vm11, %v574_v51 }
 0x126   : > { %646 = vadd.xlane.f32.xlu1 %v904_v52 }
 0x12c   : > { %917 = vmatmul.msk.f32.gmra.mxu3 %vm588_vm11, %v575_v53 }
 0x181   : > { %v635_v54 = vpop.xlane.xlu1 %634 }
 0x182   : > { %651 = vst.msk [vmem:[%s1407_s11] sm:$0xff] %vm650_vm12, %v635_v54 }
 0x189   : > { %v639_v55 = vpop.xlane.xlu1 %638 }
 0x18a   : > { %653 = vst.msk [vmem:[%s1407_s11 + $0x10] sm:$0xff] %vm650_vm12, %v639_v55 }
 0x191   : > { %v643_v56 = vpop.xlane.xlu1 %642 }
 0x192   : > { %655 = vst.msk [vmem:[%s1407_s11 + $0x20] sm:$0xff] %vm650_vm12, %v643_v56 }
 0x199   : > { %v618_v57 = vpop.f32.mrf.mxu1  ;;  %v647_v58 = vpop.xlane.xlu1 %646 }
 0x19a   : > { %630 = vst [vmem:[%s292_s14] sm:$0xff] %v618_v57  ;;  %v659_v62 = vsub.f32 %v618_v57, %v1259_v11 }
 0x19b   : > { %657 = vst.msk [vmem:[%s1407_s11 + $0x30] sm:$0xff] %vm650_vm12, %v647_v58 }
 0x19c   : > { %v663_v1 = vmul.f32 %v659_v62, %v659_v62 }
 0x19f   : > { %v621_v59 = vpop.f32.mrf.mxu3 }
 0x1a0   : > { %631 = vst [vmem:[%s292_s14 + $0x8] sm:$0xff] %v621_v59  ;;  %v660_v61 = vsub.f32 %v621_v59, %v1255_v10 }
 0x1a2   : > { %v664_v0 = vmul.f32 %v660_v61, %v660_v61 }
 0x1a4   : > { %v667_v4 = vadd.f32 %v664_v0, %v663_v1 }
 0x1a7   : > { %v624_v60 = vpop.f32.mrf.mxu3 }
 0x1a8   : > { %632 = vst [vmem:[%s292_s14 + $0x10] sm:$0xff] %v624_v60  ;;  %v661_v63 = vsub.f32 %v624_v60, %v1248_v8 }
 0x1aa   : > { %v665_v2 = vmul.f32 %v661_v63, %v661_v63 }
 0x1ac   : > { %v668_v9 = vadd.f32 %v667_v4, %v665_v2 }
 0x1af   : > { %v627_v3 = vpop.f32.mrf.mxu3 }
 0x1b0   : > { %633 = vst [vmem:[%s292_s14 + $0x18] sm:$0xff] %v627_v3  ;;  %v662_v5 = vsub.f32 %v627_v3, %v1246_v7 }
 0x1b2   : > { %v666_v6 = vmul.f32 %v662_v5, %v662_v5 }
 0x1b4   : > { %v669_v12 = vadd.f32 %v668_v9, %v666_v6 }
 0x1b6   : > { %670 = vadd.xlane.f32.xlu0 %v669_v12 }
 0x1be   : > { %636 = vadd.xlane.f32.xlu0 %v1355_v44 }
 0x1c6   : > { %640 = vadd.xlane.f32.xlu0 %v1359_v45 }
 0x1ce   : > { %644 = vadd.xlane.f32.xlu0 %v1363_v46 }
 0x1d6   : > { %648 = vadd.xlane.f32.xlu0 %v1366_v47 }
 0x1d7   : > { %1044 = shalt.err (!%p1041_p11)
}
 0x1d8   : > { %s1116_s0 = smov 128   ;;  %s1117_s27 = smov 256   ;;  %vm680_vm13 = vcmask 0  }
 0x1d9   : > { %s1118_s30 = smov 8  }
 0x1da   : > { %937 = dma.vmem_to_hbm [thread:$0]  (%p1209_p8), %s713_s13, 512, %s715_s6, %s683_s1, %s1116_s0, %s1117_s27, %s1118_s30  }
 0x1db   : > { %s889_s1 = sshll.u32 %s1397_s15, 1 }
 0x1dc   : > { %s327_s2 = sadd.s32 %s889_s1, %s1400_s16 }
 0x1dd   : > { %s328_s6 = scalar_lea.vmem %s1489_s5, %s327_s2 }
 0x229   : > { %v671_v7 = vpop.xlane.xlu0 %670 }
 0x22a   : > { %v672_v8 = vrot.slane %v671_v7, 4 }
 0x22c   : > { %v673_v10 = vadd.f32 %v672_v8, %v671_v7 }
 0x22e   : > { %v674_v11 = vrot.slane %v673_v10, 2 }
 0x230   : > { %v675_v13 = vadd.f32 %v674_v11, %v673_v10 }
 0x231   : > { %v637_v14 = vpop.xlane.xlu0 %636 }
 0x232   : > { %652 = vst.msk [vmem:[%s1407_s11 + $0x8] sm:$0xff] %vm650_vm12, %v637_v14  ;;  %v676_v15 = vrot.slane %v675_v13, 1 }
 0x234   : > { %v677_v16 = vadd.f32 %v676_v15, %v675_v13 }
 0x236   : > { %935 = vpush %v677_v16 }
 0x239   : > { %v641_v17 = vpop.xlane.xlu0 %640 }
 0x23a   : > { %654 = vst.msk [vmem:[%s1407_s11 + $0x18] sm:$0xff] %vm650_vm12, %v641_v17 }
 0x241   : > { %v645_v18 = vpop.xlane.xlu0 %644 }
 0x242   : > { %656 = vst.msk [vmem:[%s1407_s11 + $0x28] sm:$0xff] %vm650_vm12, %v645_v18 }
 0x249   : > { %v649_v19 = vpop.xlane.xlu0 %648 }
 0x24a   : > { %658 = vst.msk [vmem:[%s1407_s11 + $0x38] sm:$0xff] %vm650_vm12, %v649_v19 }
 0x267   : > { %s936_s13 = spop %935 }
 0x268   : > { %v679_v20 = vstv %s936_s13 }
 0x269   : > { %681 = vst.msk [vmem:[%s328_s6] sm:$0x1] %vm680_vm13, %v679_v20 }
 0x26a PF: > { %p943_p8 = scmp.ge.s32.totalorder %s1111_s25, 2  ;;  %s735_s9 = sand.u32 1, %s1083_s18  }
 0x26b   : > { %s736_s11 = scalar_lea.sflag [#allocation4], %s735_s9 }
 0x26c   : > { %p940_p12 = pnand %p943_p8, %p1213_p9 }
 0x26e   : > { %p941_p13 = pneg %p940_p12 }
 0x270   : > { %1078 = dma.done.wait (%p941_p13), %s736_s11, 512  }
 0x271   : > { %1080 = vsyncadd (%p941_p13), %s736_s11, 4294966784  ;;  %s19_s25 = sadd.s32 1, %s1111_s25   ;;  %s1503_s18 = smov %s1087_s19 }
 0x272   : > { %p16_p0 = scmp.ge.s32.totalorder %s19_s25, 6   ;;  %s1504_s19 = smov %s1091_s20 }
 0x273   : > { %s1505_s20 = smov %s1221_s12  ;;  %s1506_s21 = smov %s1103_s23 }
 0x274   : > { %s1507_s22 = smov %s1107_s24  ;;  %s1508_s23 = smov %s1511_s28 }
 0x275   : > { %s1509_s24 = smov %s1515_s29  ;;  %18 = sbr.rel (!%p16_p0) target bundleno = 10 (0xa), region = 134 }
 0x27a   :  { %764 = vsyncpa [#allocation4], 1 }
 0x27b   :  { %766 = vsyncpa [#allocation4 + $0x1], 1 }

</bundles_post_ra>
